<compile_context>
chip_gen: v7x
topology: tpu7x:2x2x1
jax: 0.10.0
libtpu: 0.0.40
codegen_flags: <defaults>
</compile_context>

<pallas_src>
import jax
import jax.numpy as jnp
from jax.experimental import pallas as pl
from jax.experimental.pallas import tpu as pltpu


def _round_up(v, m):
    return ((v + m - 1) // m) * m


def ffn_kernel(x_ref, w1_ref, b1_ref, w2_ref, b2_ref, o_ref, acc_ref):
    # x_ref : (TM, IN)        row tile of the input
    # w1_ref: (IN, TH)        hidden slab of weight 1 (pre-transposed)
    # b1_ref: (1, TH)         f32
    # w2_ref: (TH, OUT_PAD)   hidden slab of weight 2 (pre-transposed)
    # b2_ref: (1, OUT_PAD)    f32
    # o_ref : (TM, OUT_PAD)
    # acc_ref: (TM, OUT_PAD)  f32 accumulator, resident across the hidden axis
    kh = pl.program_id(1)

    @pl.when(kh == 0)
    def _():
        acc_ref[...] = jnp.zeros_like(acc_ref)

    # First matmul on the MXU, f32 accumulation; bias + ReLU in f32 on the VPU.
    h = jnp.dot(x_ref[...], w1_ref[...], preferred_element_type=jnp.float32)
    h = jnp.maximum(h + b1_ref[...], 0.0)
    # dropout(p=0, eval mode) -> identity.

    # Second matmul: intentional downcast of h to the compute dtype (bf16 path)
    # for MXU input; accumulate in the f32 scratch across hidden tiles.
    acc_ref[...] += jnp.dot(h.astype(w2_ref.dtype), w2_ref[...],
                            preferred_element_type=jnp.float32)

    @pl.when(kh == pl.num_programs(1) - 1)
    def _():
        o_ref[...] = (acc_ref[...] + b2_ref[...]).astype(o_ref.dtype)


def feed_forward_network(x, w1, b1, w2, b2, *,
                         tm=512, th=512,
                         compute_dtype=jnp.bfloat16):
    """Forward of FeedForwardNetwork: relu(x @ w1 + b1) @ w2 + b2.

    x : (..., input_size)
    w1: (input_size, hidden_size)   (pre-transposed vs. torch nn.Linear.weight)
    b1: (hidden_size,)
    w2: (hidden_size, output_size)
    b2: (output_size,)
    """
    orig_shape = x.shape
    out_dtype = x.dtype
    in_size, hid_size = w1.shape
    out_size = w2.shape[1]

    x2d = x.reshape(-1, in_size)
    m = x2d.shape[0]

    # ---- tile sizes: 8/128-aligned, never larger than the (padded) problem ----
    tm = max(8, _round_up(min(tm, _round_up(m, 8)), 8))
    th = max(128, _round_up(min(th, _round_up(hid_size, 128)), 128))

    m_pad = _round_up(m, tm)
    hid_pad = _round_up(hid_size, th)
    out_pad = _round_up(out_size, 128)   # lane-dense output => unmasked stores

    # ---- zero-pad + dtype conversion (zero weights/biases keep math exact) ----
    xp = jnp.zeros((m_pad, in_size), compute_dtype).at[:m, :].set(
        x2d.astype(compute_dtype))
    w1p = jnp.zeros((in_size, hid_pad), compute_dtype).at[:, :hid_size].set(
        w1.astype(compute_dtype))
    b1p = jnp.zeros((1, hid_pad), jnp.float32).at[:, :hid_size].set(
        b1.reshape(1, -1).astype(jnp.float32))
    w2p = jnp.zeros((hid_pad, out_pad), compute_dtype).at[:hid_size, :out_size].set(
        w2.astype(compute_dtype))
    b2p = jnp.zeros((1, out_pad), jnp.float32).at[:, :out_size].set(
        b2.reshape(1, -1).astype(jnp.float32))

    grid = (m_pad // tm, hid_pad // th)

    itemsize = jnp.dtype(compute_dtype).itemsize
    cost = pl.CostEstimate(
        flops=2 * m_pad * (in_size * hid_pad + hid_pad * out_pad),
        transcendentals=0,
        bytes_accessed=(xp.size * itemsize + w1p.size * itemsize
                        + w2p.size * itemsize + b1p.size * 4 + b2p.size * 4
                        + m_pad * out_pad * jnp.dtype(out_dtype).itemsize),
    )

    out = pl.pallas_call(
        ffn_kernel,
        out_shape=jax.ShapeDtypeStruct((m_pad, out_pad), out_dtype),
        grid_spec=pltpu.PrefetchScalarGridSpec(
            num_scalar_prefetch=0,
            grid=grid,
            in_specs=[
                pl.BlockSpec((tm, in_size), lambda i, k: (i, 0)),   # x rows
                pl.BlockSpec((in_size, th), lambda i, k: (0, k)),   # w1 hid slab
                pl.BlockSpec((1, th),       lambda i, k: (0, k)),   # b1 hid slab
                pl.BlockSpec((th, out_pad), lambda i, k: (k, 0)),   # w2 hid slab
                pl.BlockSpec((1, out_pad),  lambda i, k: (0, 0)),   # b2
            ],
            out_specs=pl.BlockSpec((tm, out_pad), lambda i, k: (i, 0)),
            scratch_shapes=[pltpu.VMEM((tm, out_pad), jnp.float32)],
        ),
        compiler_params=pltpu.CompilerParams(
            dimension_semantics=("parallel", "arbitrary"),
            vmem_limit_bytes=48 * 1024 * 1024),
        cost_estimate=cost,
    )(xp, w1p, b1p, w2p, b2p)

    out = out[:m, :out_size]
    return out.reshape(*orig_shape[:-1], out_size)


if __name__ == "__main__":
    # Module config (small, consistent with nn.Linear shapes)
    batch, seq = 2, 8
    input_size, hidden_size, output_size = 32, 64, 32

    key = jax.random.PRNGKey(0)
    k_x, k_w1, k_b1, k_w2, k_b2 = jax.random.split(key, 5)

    x = jax.random.normal(k_x, (batch, seq, input_size), dtype=jnp.float32)

    # Deterministic "uniform(-1/sqrt(fan_in), 1/sqrt(fan_in))" style init,
    # stored pre-transposed as (in, out) for the kernel.
    lim1 = 1.0 / (input_size ** 0.5)
    lim2 = 1.0 / (hidden_size ** 0.5)
    w1 = jax.random.uniform(k_w1, (input_size, hidden_size),
                            minval=-lim1, maxval=lim1, dtype=jnp.float32)
    b1 = jax.random.uniform(k_b1, (hidden_size,),
                            minval=-lim1, maxval=lim1, dtype=jnp.float32)
    w2 = jax.random.uniform(k_w2, (hidden_size, output_size),
                            minval=-lim2, maxval=lim2, dtype=jnp.float32)
    b2 = jax.random.uniform(k_b2, (output_size,),
                            minval=-lim2, maxval=lim2, dtype=jnp.float32)

    # Pure-JAX reference (same semantics as the PyTorch forward, eval mode).
    ref = jnp.maximum(x @ w1 + b1, 0.0) @ w2 + b2

    # 1) f32 compute path: exact-dtype check.
    out_f32 = feed_forward_network(x, w1, b1, w2, b2,
                                   compute_dtype=jnp.float32)
    out_f32 = jax.block_until_ready(out_f32)
    assert out_f32.shape == (batch, seq, output_size)
    assert jnp.allclose(out_f32, ref, atol=1e-5, rtol=1e-5), "f32 mismatch"

    # 2) bf16 compute path (default, MXU-native): loose tolerance check.
    out_bf16 = feed_forward_network(x, w1, b1, w2, b2,
                                    compute_dtype=jnp.bfloat16)
    out_bf16 = jax.block_until_ready(out_bf16)
    assert out_bf16.shape == (batch, seq, output_size)
    assert jnp.allclose(out_bf16, ref, atol=5e-2, rtol=5e-2), "bf16 mismatch"

    # 3) Non-tile-divisible leading dims exercise the padding path.
    x_odd = jax.random.normal(k_x, (3, 5, input_size), dtype=jnp.float32)
    ref_odd = jnp.maximum(x_odd @ w1 + b1, 0.0) @ w2 + b2
    out_odd = feed_forward_network(x_odd, w1, b1, w2, b2,
                                   compute_dtype=jnp.float32)
    out_odd = jax.block_until_ready(out_odd)
    assert out_odd.shape == (3, 5, output_size)
    assert jnp.allclose(out_odd, ref_odd, atol=1e-5, rtol=1e-5), "padding mismatch"

    print("KERNEL_OK")
</pallas_src>

<mosaic_0001>
module attributes {stable_mosaic.version = 11 : i64} {
  func.func @ffn_kernel(%arg0: i32, %arg1: i32, %arg2: memref<16x32xf32, #tpu.memory_space<vmem>>, %arg3: memref<32x128xf32, #tpu.memory_space<vmem>>, %arg4: memref<1x128xf32, #tpu.memory_space<vmem>>, %arg5: memref<128x128xf32, #tpu.memory_space<vmem>>, %arg6: memref<1x128xf32, #tpu.memory_space<vmem>>, %arg7: memref<16x128xf32, #tpu.memory_space<vmem>>, %arg8: memref<16x128xf32, #tpu.memory_space<vmem>>) attributes {dimension_semantics = [#tpu.dimension_semantics<parallel>, #tpu.dimension_semantics<arbitrary>], iteration_bounds = array<i64: 1, 1>, scalar_prefetch = 0 : i64, scratch_operands = 1 : i64, tpu.core_type = #tpu.core_type<tc>, window_params = [{transform_indices = @transform_0, window_bounds = array<i64: 16, 32>}, {transform_indices = @transform_1, window_bounds = array<i64: 32, 128>}, {transform_indices = @transform_2, window_bounds = array<i64: 1, 128>}, {transform_indices = @transform_3, window_bounds = array<i64: 128, 128>}, {pipeline_mode = #tpu.pipeline_mode<synchronous>, transform_indices = @transform_4, window_bounds = array<i64: 1, 128>}, {transform_indices = @transform_5, window_bounds = array<i64: 16, 128>}]} {
    %c0_i32 = arith.constant 0 : i32
    %0 = arith.cmpi eq, %arg1, %c0_i32 : i32
    %1 = arith.extui %0 : i1 to i32
    %c0_i32_0 = arith.constant 0 : i32
    %2 = arith.cmpi ne, %1, %c0_i32_0 : i32
    scf.if %2 {
      %cst_16 = arith.constant 0.000000e+00 : f32
      %19 = vector.broadcast %cst_16 : f32 to vector<16x128xf32>
      %c0_17 = arith.constant 0 : index
      %c0_18 = arith.constant 0 : index
      %20 = vector.load %arg8[%c0_17, %c0_18] : memref<16x128xf32, #tpu.memory_space<vmem>>, vector<16x128xf32>
      tpu.vector_store %arg8[%c0_17, %c0_18], %19 {strides = array<i32>} : memref<16x128xf32, #tpu.memory_space<vmem>>, vector<16x128xf32>,
    } else {
    }
    %c0 = arith.constant 0 : index
    %c0_1 = arith.constant 0 : index
    %3 = vector.load %arg2[%c0, %c0_1] : memref<16x32xf32, #tpu.memory_space<vmem>>, vector<16x32xf32>
    %c0_2 = arith.constant 0 : index
    %c0_3 = arith.constant 0 : index
    %4 = vector.load %arg3[%c0_2, %c0_3] : memref<32x128xf32, #tpu.memory_space<vmem>>, vector<32x128xf32>
    %cst = arith.constant dense<0.000000e+00> : vector<16x128xf32>
    %5 = tpu.matmul %3, %4, %cst {dimension_numbers = #tpu.dot_dimension_numbers<[1], [0], [0], [1], [0, 0, 1, 1], [], []>} : vector<16x32xf32>, vector<32x128xf32>, vector<16x128xf32> -> vector<16x128xf32>
    %c0_4 = arith.constant 0 : index
    %c0_5 = arith.constant 0 : index
    %6 = vector.load %arg4[%c0_4, %c0_5] : memref<1x128xf32, #tpu.memory_space<vmem>>, vector<1x128xf32>
    %7 = vector.broadcast %6 : vector<1x128xf32> to vector<16x128xf32>
    %8 = arith.addf %5, %7 : vector<16x128xf32>
    %cst_6 = arith.constant 0.000000e+00 : f32
    %9 = vector.broadcast %cst_6 : f32 to vector<16x128xf32>
    %10 = arith.maximumf %8, %9 : vector<16x128xf32>
    %c0_7 = arith.constant 0 : index
    %c0_8 = arith.constant 0 : index
    %11 = vector.load %arg8[%c0_7, %c0_8] : memref<16x128xf32, #tpu.memory_space<vmem>>, vector<16x128xf32>
    %c0_9 = arith.constant 0 : index
    %c0_10 = arith.constant 0 : index
    %12 = vector.load %arg5[%c0_9, %c0_10] : memref<128x128xf32, #tpu.memory_space<vmem>>, vector<128x128xf32>
    %cst_11 = arith.constant dense<0.000000e+00> : vector<16x128xf32>
    %13 = tpu.matmul %10, %12, %cst_11 {dimension_numbers = #tpu.dot_dimension_numbers<[1], [0], [0], [1], [0, 0, 1, 1], [], []>} : vector<16x128xf32>, vector<128x128xf32>, vector<16x128xf32> -> vector<16x128xf32>
    %14 = arith.addf %11, %13 : vector<16x128xf32>
    %c0_12 = arith.constant 0 : index
    %c0_13 = arith.constant 0 : index
    %15 = vector.load %arg8[%c0_12, %c0_13] : memref<16x128xf32, #tpu.memory_space<vmem>>, vector<16x128xf32>
    tpu.vector_store %arg8[%c0_12, %c0_13], %14 {strides = array<i32>} : memref<16x128xf32, #tpu.memory_space<vmem>>, vector<16x128xf32>,
    %c0_i32_14 = arith.constant 0 : i32
    %16 = arith.cmpi eq, %arg1, %c0_i32_14 : i32
    %17 = arith.extui %16 : i1 to i32
    %c0_i32_15 = arith.constant 0 : i32
    %18 = arith.cmpi ne, %17, %c0_i32_15 : i32
    scf.if %18 {
      %c0_16 = arith.constant 0 : index
      %c0_17 = arith.constant 0 : index
      %19 = vector.load %arg8[%c0_16, %c0_17] : memref<16x128xf32, #tpu.memory_space<vmem>>, vector<16x128xf32>
      %c0_18 = arith.constant 0 : index
      %c0_19 = arith.constant 0 : index
      %20 = vector.load %arg6[%c0_18, %c0_19] : memref<1x128xf32, #tpu.memory_space<vmem>>, vector<1x128xf32>
      %21 = vector.broadcast %20 : vector<1x128xf32> to vector<16x128xf32>
      %22 = arith.addf %19, %21 : vector<16x128xf32>
      %c0_20 = arith.constant 0 : index
      %c0_21 = arith.constant 0 : index
      %23 = vector.load %arg7[%c0_20, %c0_21] : memref<16x128xf32, #tpu.memory_space<vmem>>, vector<16x128xf32>
      tpu.vector_store %arg7[%c0_20, %c0_21], %22 {strides = array<i32>} : memref<16x128xf32, #tpu.memory_space<vmem>>, vector<16x128xf32>,
    } else {
    }
    return
  }
  func.func @transform_0(%arg0: i32, %arg1: i32) -> (i32, i32) {
    %c0_i32 = arith.constant 0 : i32
    %c0_i32_0 = arith.constant 0 : i32
    return %arg0, %c0_i32 : i32, i32
  }
  func.func @transform_1(%arg0: i32, %arg1: i32) -> (i32, i32) {
    %c0_i32 = arith.constant 0 : i32
    %c0_i32_0 = arith.constant 0 : i32
    return %c0_i32, %arg1 : i32, i32
  }
  func.func @transform_2(%arg0: i32, %arg1: i32) -> (i32, i32) {
    %c0_i32 = arith.constant 0 : i32
    %c0_i32_0 = arith.constant 0 : i32
    return %c0_i32, %arg1 : i32, i32
  }
  func.func @transform_3(%arg0: i32, %arg1: i32) -> (i32, i32) {
    %c0_i32 = arith.constant 0 : i32
    %c0_i32_0 = arith.constant 0 : i32
    return %arg1, %c0_i32 : i32, i32
  }
  func.func @transform_4(%arg0: i32, %arg1: i32) -> (i32, i32) {
    %c0_i32 = arith.constant 0 : i32
    %c0_i32_0 = arith.constant 0 : i32
    %c0_i32_1 = arith.constant 0 : i32
    return %c0_i32, %c0_i32_0 : i32, i32
  }
  func.func @transform_5(%arg0: i32, %arg1: i32) -> (i32, i32) {
    %c0_i32 = arith.constant 0 : i32
    %c0_i32_0 = arith.constant 0 : i32
    return %arg0, %c0_i32 : i32, i32
  }
}

</mosaic_0001>

<bundles_post_ra>
// kernel: tpu_custom_call.1
= control target key start
LH: loop header
LB: loop body
LE: loop exit
PB: predicated region body
PF: predicated region fallthrough
CT: control target
= control target key end

     0   :  { %10 = vsyncpa [#allocation4], 0  ;;  %s621_s0 = inlined_call_operand.hbm [shape: f32[16,32], index: 0, kind: input, shape index: {}]   ;;  %s622_s1 = inlined_call_operand.hbm [shape: f32[32,128], index: 1, kind: input, shape index: {}]   ;;  %s623_s2 = inlined_call_operand.vmem [shape: f32[1,128], index: 2, kind: input, shape index: {}]   ;;  %s624_s3 = inlined_call_operand.hbm [shape: f32[128,128], index: 3, kind: input, shape index: {}]   ;;  %s625_s4 = inlined_call_operand.vmem [shape: f32[1,128], index: 4, kind: input, shape index: {}]   ;;  %s626_s5 = inlined_call_operand.hbm [shape: f32[16,128], index: 5, kind: output, shape index: {}]  }
   0x1   :  { %11 = vsyncpa [#allocation7], 0 }
   0x2   :  { %12 = vsyncpa [#allocation5], 0  ;;  %s510_s18 = smov [#allocation6]   ;;  %s511_s20 = smov [#allocation3]  }
   0x3   :  { %s30_s19 = sshll.u32 %s510_s18, 4  ;;  %s18_s21 = sshll.u32 %s511_s20, 4  ;;  %s31_s19 = int_to_ptr.vmem [resolvable:$true] %s30_s19  ;;  %s546_s21 = int_to_ptr.vmem [resolvable:$true] %s18_s21 }
   0x4   :  { %s416_s24 = scalar_lea.hbm %s622_s1, 512 }
   0x5   :  { %p417_p0 = scmp.ne.s32.totalorder %s622_s1, %s416_s24  ;;  %p420_p1 = scmp.lt.u32.totalorder %s416_s24, %s622_s1 }
   0x7   :  { %p422_p2 = pnand %p420_p1, %p417_p0 }
   0x9   :  { %425 = shalt.err (!%p422_p2)
}
   0xa   :  { %s426_s29 = scalar_lea.vmem %s31_s19, 512  ;;  %p431_p4 = scmp.lt.s32.totalorder %s31_s19, %s31_s19 }
   0xb   :  { %p427_p3 = scmp.ne.s32.totalorder %s31_s19, %s426_s29  ;;  %p432_p5 = scmp.lt.s32.totalorder %s426_s29, %s426_s29 }
   0xd   :  { %p433_p6 = por %p432_p5, %p431_p4 }
   0xf   :  { %p434_p7 = pnand %p433_p6, %p427_p3 }
  0x11   :  { %437 = shalt.err (!%p434_p7)
}
  0x12   :  { %s512_s30 = smov 128   ;;  %s513_s6 = smov 8  }
  0x13   :  { %36 = dma.hbm_to_vmem [thread:$0]  %s622_s1, 512, %s31_s19, [#allocation7], %s512_s30, %s512_s30, %s513_s6  }
  0x14   :  { %s438_s11 = scalar_lea.hbm %s621_s0, 256 }
  0x15   :  { %p439_p8 = scmp.ne.s32.totalorder %s621_s0, %s438_s11  ;;  %p442_p9 = scmp.lt.u32.totalorder %s438_s11, %s621_s0 }
  0x17   :  { %p444_p10 = pnand %p442_p9, %p439_p8 }
  0x19   :  { %447 = shalt.err (!%p444_p10)
}
  0x1a   :  { %s448_s16 = scalar_lea.vmem %s546_s21, 256  ;;  %p453_p12 = scmp.lt.s32.totalorder %s546_s21, %s546_s21 }
  0x1b   :  { %p449_p11 = scmp.ne.s32.totalorder %s546_s21, %s448_s16  ;;  %p454_p13 = scmp.lt.s32.totalorder %s448_s16, %s448_s16 }
  0x1d   :  { %p455_p0 = por %p454_p13, %p453_p12 }
  0x1f   :  { %p456_p1 = pnand %p455_p0, %p449_p11 }
  0x21   :  { %459 = shalt.err (!%p456_p1)
}
  0x22   :  { %24 = dma.hbm_to_vmem [thread:$0]  %s621_s0, 256, %s546_s21, [#allocation4], %s512_s30, %s512_s30, %s513_s6  }
  0x23   :  { %s514_s18 = smov [#allocation8]   ;;  %s460_s23 = scalar_lea.hbm %s624_s3, 2048 }
  0x24   :  { %s44_s19 = sshll.u32 %s514_s18, 4  ;;  %p461_p2 = scmp.ne.s32.totalorder %s624_s3, %s460_s23  ;;  %s45_s19 = int_to_ptr.vmem [resolvable:$true] %s44_s19 }
  0x25   :  { %p464_p3 = scmp.lt.u32.totalorder %s460_s23, %s624_s3 }
  0x27   :  { %p466_p4 = pnand %p464_p3, %p461_p2 }
  0x29   :  { %469 = shalt.err (!%p466_p4)
}
  0x2a   :  { %s470_s28 = scalar_lea.vmem %s45_s19, 2048  ;;  %p475_p6 = scmp.lt.s32.totalorder %s45_s19, %s45_s19 }
  0x2b   :  { %p471_p5 = scmp.ne.s32.totalorder %s45_s19, %s470_s28  ;;  %p476_p7 = scmp.lt.s32.totalorder %s470_s28, %s470_s28 }
  0x2d   :  { %p477_p8 = por %p476_p7, %p475_p6 }
  0x2f   :  { %p478_p9 = pnand %p477_p8, %p471_p5 }
  0x31   :  { %481 = shalt.err (!%p478_p9)
}
  0x32   :  { %50 = dma.hbm_to_vmem [thread:$0]  %s624_s3, 2048, %s45_s19, [#allocation7], %s512_s30, %s512_s30, %s513_s6  }
  0x33   :  { %504 = dma.done.wait [#allocation4], 256  }
  0x34   :  { %505 = vsyncadd [#allocation4], 4294967040 }
  0x35   :  { %506 = dma.done.wait [#allocation7], 2560  }
  0x36   :  { %507 = vsyncadd [#allocation7], 4294964736  ;;  %vm81_vm0 = vcmask 261120   ;;  %v70_v0 = vld [vmem:[#allocation6] sm:$0xff]  ;;  %v71_v1 = vld [vmem:[#allocation6 + $0x8] sm:$0xff]  ;;  %s515_s9 = smov [#allocation9]  }
  0x37   :  { %v72_v2 = vld [vmem:[#allocation6 + $0x10] sm:$0xff]  ;;  %v370_v3 = vpack.c.bf16 %v71_v1, %v70_v0  ;;  %v73_v4 = vld [vmem:[#allocation6 + $0x18] sm:$0xff]  ;;  %v167_v7 = vld [vmem:[#allocation8] sm:$0xff]  ;;  %s283_s10 = sshll.u32 %s515_s9, 4  ;;  %s284_s10 = int_to_ptr.vmem [resolvable:$true] %s283_s10 }
  0x38   :  { %v68_v5 = vld [vmem:[#allocation3] sm:$0xff]  ;;  %v374_v6 = vpack.c.bf16 %v73_v4, %v72_v2  ;;  %v168_v8 = vld [vmem:[#allocation8 + $0x8] sm:$0xff]  ;;  %v170_v11 = vld [vmem:[#allocation8 + $0x18] sm:$0xff]  ;;  %p487_p11 = scmp.lt.s32.totalorder %s284_s10, %s284_s10 }
  0x39   :  { %332 = vmatprep.mubr.msk.f32.mxu0 %vm81_vm0, %v68_v5  ;;  %v169_v9 = vld [vmem:[#allocation8 + $0x10] sm:$0xff]  ;;  %371 = vmatprep.subr.bf16.mxu0 %v370_v3  ;;  %v378_v10 = vpack.c.bf16 %v168_v8, %v167_v7  ;;  %v171_v13 = vld [vmem:[#allocation8 + $0x20] sm:$0xff]  ;;  %v172_v14 = vld [vmem:[#allocation8 + $0x28] sm:$0xff] }
  0x3a   :  { %373 = vmatpush3.bf16.msra.mxu0 %v370_v3  ;;  %v382_v12 = vpack.c.bf16 %v170_v11, %v169_v9  ;;  %v386_v15 = vpack.c.bf16 %v172_v14, %v171_v13  ;;  %v69_v16 = vld [vmem:[#allocation3 + $0x8] sm:$0xff]  ;;  %v173_v17 = vld [vmem:[#allocation8 + $0x30] sm:$0xff]  ;;  %v175_v20 = vld [vmem:[#allocation8 + $0x40] sm:$0xff] }
  0x3b   :  { %375 = vmatprep.subr.bf16.mxu0 %v374_v6  ;;  %379 = vmatprep.subr.bf16.mxu1 %v378_v10  ;;  %v174_v18 = vld [vmem:[#allocation8 + $0x38] sm:$0xff]  ;;  %v176_v21 = vld [vmem:[#allocation8 + $0x48] sm:$0xff]  ;;  %v177_v23 = vld [vmem:[#allocation8 + $0x50] sm:$0xff] }
  0x3c   :  { %381 = vmatpush3.bf16.msra.mxu1 %v378_v10  ;;  %v390_v19 = vpack.c.bf16 %v174_v18, %v173_v17  ;;  %v394_v22 = vpack.c.bf16 %v176_v21, %v175_v20  ;;  %v178_v24 = vld [vmem:[#allocation8 + $0x58] sm:$0xff]  ;;  %v179_v26 = vld [vmem:[#allocation8 + $0x60] sm:$0xff]  ;;  %v180_v27 = vld [vmem:[#allocation8 + $0x68] sm:$0xff] }
  0x3d   :  { %383 = vmatprep.subr.bf16.mxu1 %v382_v12  ;;  %v398_v25 = vpack.c.bf16 %v178_v24, %v177_v23  ;;  %v402_v28 = vpack.c.bf16 %v180_v27, %v179_v26  ;;  %v181_v29 = vld [vmem:[#allocation8 + $0x70] sm:$0xff]  ;;  %v182_v30 = vld [vmem:[#allocation8 + $0x78] sm:$0xff] }
  0x3e   :  { %377 = vmatpush3.bf16.msra.mxu0 %v374_v6  ;;  %v406_v31 = vpack.c.bf16 %v182_v30, %v181_v29  ;;  %v296_v32 = vld [vmem:[%s623_s2] ss:$0 sm:$0xff]  ;;  %s482_s2 = scalar_lea.vmem %s284_s10, 256 }
  0x3f   :  { %v299_v39 = vld [vmem:[%s625_s4] ss:$0 sm:$0xff]  ;;  %p483_p10 = scmp.ne.s32.totalorder %s284_s10, %s482_s2  ;;  %p488_p12 = scmp.lt.s32.totalorder %s482_s2, %s482_s2 }
  0x40   :  { %385 = vmatpush3.bf16.msra.mxu1 %v382_v12 }
  0x41   :  { %333 = vmatmul.mubr.msk.f32.vlgmr.msra.gmra.mrb[0].mxu0 %vm81_vm0, %v69_v16  ;;  %387 = vmatprep.subr.bf16.mxu1 %v386_v15  ;;  %p489_p13 = por %p488_p12, %p487_p11 }
  0x43   :  { %p490_p0 = pnand %p489_p13, %p483_p10 }
  0x44   :  { %389 = vmatpush3.bf16.msra.mxu1 %v386_v15 }
  0x45   :  { %391 = vmatprep.subr.bf16.mxu1 %v390_v19 }
  0x48   :  { %393 = vmatpush3.bf16.msra.mxu1 %v390_v19 }
  0x49   :  { %395 = vmatprep.subr.bf16.mxu1 %v394_v22 }
  0x4c   :  { %397 = vmatpush3.bf16.msra.mxu1 %v394_v22 }
  0x4d   :  { %399 = vmatprep.subr.bf16.mxu1 %v398_v25 }
  0x50   :  { %401 = vmatpush3.bf16.msra.mxu1 %v398_v25 }
  0x51   :  { %403 = vmatprep.subr.bf16.mxu1 %v402_v28 }
  0x54   :  { %405 = vmatpush3.bf16.msra.mxu1 %v402_v28 }
  0x55   :  { %407 = vmatprep.subr.bf16.mxu1 %v406_v31 }
  0x58   :  { %409 = vmatpush3.bf16.msra.mxu1 %v406_v31 }
 0x114   :  { %v334_v33 = vpop.f32.mrb[0].mxu0 }
 0x115   :  { %v160_v34 = vadd.f32 %v334_v33, %v296_v32  ;;  %v154_v35 = vpop.f32.mrb[1].mxu0 }
 0x116   :  { %v155_v36 = vadd.f32 %v296_v32, %v154_v35 }
 0x117   :  { %v164_v38 = vmax.f32 %v160_v34, 0.0 }
 0x118   :  { %v163_v37 = vmax.f32 %v155_v36, 0.0 }
 0x11a   :  { %367 = vmatprep.mubr.f32.mxu1 %v163_v37 }
 0x11b   :  { %368 = vmatmul.mubr.f32.vlgmr.msra.gmra.mrb[0].mxu1 %v164_v38 }
 0x1ee   :  { %v369_v40 = vpop.f32.mrb[0].mxu1 }
 0x1ef   :  { %v275_v41 = vadd.f32 %v369_v40, %v299_v39  ;;  %v249_v42 = vpop.f32.mrb[1].mxu1 }
 0x1f0   :  { %v274_v43 = vadd.f32 %v299_v39, %v249_v42 }
 0x1f1   :  { %277 = vst [vmem:[#allocation9 + $0x8] sm:$0xff] %v275_v41 }
 0x1f2   :  { %276 = vst [vmem:[#allocation9] sm:$0xff] %v274_v43 }
 0x1f3   :  { %493 = shalt.err (!%p490_p0)
}
 0x1f4   :  { %s494_s4 = scalar_lea.hbm %s626_s5, 256 }
 0x1f5   :  { %p495_p1 = scmp.ne.s32.totalorder %s626_s5, %s494_s4  ;;  %p498_p2 = scmp.lt.u32.totalorder %s494_s4, %s626_s5 }
 0x1f7   :  { %p500_p3 = pnand %p498_p2, %p495_p1 }
 0x1f9   :  { %503 = shalt.err (!%p500_p3)
}
 0x1fa   :  { %289 = dma.vmem_to_hbm [thread:$0]  %s284_s10, 256, %s626_s5, [#allocation5], %s512_s30, %s512_s30, %s513_s6  }
 0x1fb   :  { %508 = dma.done.wait [#allocation5], 256  }
 0x1fc   :  { %509 = vsyncadd [#allocation5], 4294967040 }
 0x1fd   :  { %293 = vsyncpa [#allocation4], 1 }
 0x1fe   :  { %294 = vsyncpa [#allocation7], 1 }
 0x1ff   :  { %295 = vsyncpa [#allocation5], 1 }

</bundles_post_ra>
